<compile_context>
chip_gen: v7x
topology: tpu7x:2x2x1
jax: 0.10.0
libtpu: 0.0.40
codegen_flags: <defaults>
</compile_context>

<pallas_src>
import functools
import math

import jax
import jax.numpy as jnp
from jax import lax
from jax.experimental import pallas as pl
from jax.experimental.pallas import tpu as pltpu


_MASK_VALUE = -1e30          # finite "-inf": exp underflows to exactly 0 (s is always f32)


def _default_vmem_limit():
    """Generation-aware scoped-VMEM budget (3/4 of physical, clamped to [32, 100] MiB)."""
    try:
        info = pltpu.get_tpu_info()
        cap = int(getattr(info, "vmem_capacity_bytes", 64 * 1024 * 1024))
    except Exception:
        cap = 64 * 1024 * 1024
    return int(max(32 * 1024 * 1024, min((cap * 3) // 4, 100 * 1024 * 1024)))


_VMEM_LIMIT = _default_vmem_limit()


def _pick_tile(dim, candidates):
    """Largest candidate tile dividing `dim`, else the full dim (always legal)."""
    for c in candidates:
        if dim % c == 0:
            return c
    return dim


# ---------------------------------------------------------------------------
# Tiled linear:  (M, K) @ (N, K)^T + (1, N) -> (M, N)
# Weights stay in PyTorch (out_features, in_features) layout; the contraction is done with
# dot_general over the K axes so no transposed weight copy is ever materialized.
# ---------------------------------------------------------------------------
def _linear_kernel(x_ref, w_ref, b_ref, o_ref, acc_ref):
    @pl.when(pl.program_id(2) == 0)
    def _():
        acc_ref[...] = jnp.zeros_like(acc_ref)

    acc_ref[...] += lax.dot_general(
        x_ref[...], w_ref[...],
        dimension_numbers=(((1,), (1,)), ((), ())),
        preferred_element_type=jnp.float32)

    @pl.when(pl.program_id(2) == pl.num_programs(2) - 1)
    def _():
        o_ref[...] = (acc_ref[...] + b_ref[...].astype(jnp.float32)).astype(o_ref.dtype)


def _linear(x, w, b, *, out_dtype):
    """x: (M, K); w: (N, K) PyTorch layout; b: (1, N) f32."""
    M, K = x.shape
    N, K2 = w.shape
    assert K == K2 and b.shape == (1, N)

    tm = _pick_tile(M, (512, 256, 128, 64, 32, 16, 8))
    tn = _pick_tile(N, (512, 256, 128))
    tk = _pick_tile(K, (512, 256, 128))

    return pl.pallas_call(
        _linear_kernel,
        out_shape=jax.ShapeDtypeStruct((M, N), out_dtype),
        grid_spec=pltpu.PrefetchScalarGridSpec(
            num_scalar_prefetch=0,
            grid=(M // tm, N // tn, K // tk),
            in_specs=[
                pl.BlockSpec((tm, tk), lambda i, j, k: (i, k)),
                pl.BlockSpec((tn, tk), lambda i, j, k: (j, k)),
                pl.BlockSpec((1, tn), lambda i, j, k: (0, j)),
            ],
            out_specs=pl.BlockSpec((tm, tn), lambda i, j, k: (i, j)),
            scratch_shapes=[pltpu.VMEM((tm, tn), jnp.float32)],
        ),
        compiler_params=pltpu.CompilerParams(
            dimension_semantics=("parallel", "parallel", "arbitrary"),
            vmem_limit_bytes=_VMEM_LIMIT),
    )(x, w, b)


# ---------------------------------------------------------------------------
# Flash-style causal attention over a lower-triangular (q_block, kv_block) schedule.
#
# The flattened triangular step axis is driven by scalar-prefetched qi[]/ki[] tables: each
# grid step is a real (below-or-on-diagonal) block, so no DMA or pipeline overhead is spent
# on masked blocks.  Steps for a given q block are contiguous and end on the diagonal block,
# where the output is normalized and written.
# ---------------------------------------------------------------------------
def _flash_tri_kernel(qi_tab, ki_tab, q_ref, k_ref, v_ref, o_ref,
                      m_sc, l_sc, acc_sc, *, tq, tkv):
    t = pl.program_id(1)
    q_blk = qi_tab[t]
    k_blk = ki_tab[t]

    @pl.when(k_blk == 0)
    def _():
        m_sc[...] = jnp.full_like(m_sc, -jnp.inf)
        l_sc[...] = jnp.zeros_like(l_sc)
        acc_sc[...] = jnp.zeros_like(acc_sc)

    def update(masked):
        q = q_ref[0]                                   # (tq, hd), scale already folded in
        k = k_ref[0]                                   # (tkv, hd)
        # QK^T without an explicit transpose: contract head dims directly on the MXU.
        s = lax.dot_general(q, k, (((1,), (1,)), ((), ())),
                            preferred_element_type=jnp.float32)       # (tq, tkv) f32
        if masked:
            # Only the diagonal block needs the causal mask (and it also excludes any
            # zero-padded key columns, which always satisfy col >= T > row for valid rows).
            row = q_blk * tq + lax.broadcasted_iota(jnp.int32, (tq, tkv), 0)
            col = k_blk * tkv + lax.broadcasted_iota(jnp.int32, (tq, tkv), 1)
            s = jnp.where(row >= col, s, _MASK_VALUE)

        m_prev = m_sc[...]
        m_new = jnp.maximum(m_prev, jnp.max(s, axis=-1, keepdims=True))
        alpha = jnp.exp(m_prev - m_new)
        p = jnp.exp(s - m_new)
        l_sc[...] = alpha * l_sc[...] + jnp.sum(p, axis=-1, keepdims=True)
        acc_sc[...] = alpha * acc_sc[...] + jnp.dot(
            p.astype(v_ref.dtype), v_ref[0], preferred_element_type=jnp.float32)
        m_sc[...] = m_new

    # Strictly-below-diagonal blocks: every column is causal-valid -> no mask ops at all.
    @pl.when(k_blk < q_blk)
    def _():
        update(False)

    # Diagonal block: masked update; it is the last step for this q block -> finalize.
    @pl.when(k_blk == q_blk)
    def _():
        update(True)
        inv_l = pl.reciprocal(l_sc[...], approx=True)   # EUP approximate path
        o_ref[0] = (acc_sc[...] * inv_l).astype(o_ref.dtype)


def _flash_attention(qkv3, *, tq, out_dtype):
    """qkv3: (3*BH, T_pad, hd) with Q heads in [0,BH), K in [BH,2BH), V in [2BH,3BH)."""
    three_bh, T_pad, hd = qkv3.shape
    BH = three_bh // 3
    tkv = tq
    assert T_pad % tq == 0
    nq = T_pad // tq

    # Lower-triangle (q_block, kv_block) schedule, kv innermost so each q block's steps are
    # contiguous and end on its diagonal (finalize) step.
    qi_list, ki_list = [], []
    for qi in range(nq):
        for ki in range(qi + 1):
            qi_list.append(qi)
            ki_list.append(ki)
    qi_tab = jnp.asarray(qi_list, dtype=jnp.int32)
    ki_tab = jnp.asarray(ki_list, dtype=jnp.int32)
    n_steps = len(qi_list)

    kernel = functools.partial(_flash_tri_kernel, tq=tq, tkv=tkv)

    return pl.pallas_call(
        kernel,
        out_shape=jax.ShapeDtypeStruct((BH, T_pad, hd), out_dtype),
        grid_spec=pltpu.PrefetchScalarGridSpec(
            num_scalar_prefetch=2,
            grid=(BH, n_steps),
            in_specs=[
                # Q stays resident across its kv steps (block index unchanged -> no re-DMA).
                pl.BlockSpec((1, tq, hd),  lambda b, t, qi, ki: (b, qi[t], 0)),
                pl.BlockSpec((1, tkv, hd), lambda b, t, qi, ki: (BH + b, ki[t], 0)),
                pl.BlockSpec((1, tkv, hd), lambda b, t, qi, ki: (2 * BH + b, ki[t], 0)),
            ],
            out_specs=pl.BlockSpec((1, tq, hd), lambda b, t, qi, ki: (b, qi[t], 0)),
            scratch_shapes=[
                pltpu.VMEM((tq, 1), jnp.float32),     # running max
                pltpu.VMEM((tq, 1), jnp.float32),     # running sum
                pltpu.VMEM((tq, hd), jnp.float32),    # output accumulator
            ],
        ),
        compiler_params=pltpu.CompilerParams(
            dimension_semantics=("parallel", "arbitrary"),
            vmem_limit_bytes=_VMEM_LIMIT),
    )(qi_tab, ki_tab, qkv3, qkv3, qkv3)


def _attention_tiles(T):
    """Pick (tq, T_pad): prefer 256, then 128; tiny T uses a single full-size block."""
    if T <= 128:
        return T, T
    T_pad = ((T + 127) // 128) * 128
    tq = 256 if T_pad % 256 == 0 else 128
    return tq, T_pad


# ---------------------------------------------------------------------------
# Full CausalSelfAttention forward.
# ---------------------------------------------------------------------------
def causal_self_attention(x, w_attn, b_attn, w_proj, b_proj, *, n_head,
                          compute_dtype=jnp.bfloat16):
    """x: (B, T, C); w_attn: (3C, C); b_attn: (3C,); w_proj: (C, C); b_proj: (C,)."""
    B, T, C = x.shape
    assert C % n_head == 0
    H = n_head
    hd = C // n_head
    in_dtype = x.dtype

    # Fold 1/sqrt(hd) into the Q rows of the QKV projection; fused with the compute-dtype
    # cast of the weights so it costs nothing extra.  (For production, do this once outside
    # the jitted forward.)
    scale = 1.0 / math.sqrt(hd)
    row_scale = jnp.concatenate([jnp.full((C,), scale, jnp.float32),
                                 jnp.ones((2 * C,), jnp.float32)])
    w_attn_c = (w_attn.astype(jnp.float32) * row_scale[:, None]).astype(compute_dtype)
    b_attn_c = (b_attn.astype(jnp.float32) * row_scale).reshape(1, 3 * C)   # bias stays f32
    w_proj_c = w_proj.astype(compute_dtype)
    b_proj_c = b_proj.astype(jnp.float32).reshape(1, C)

    # 1) QKV projection (tiled matmul kernel, bf16 MXU path, f32 accumulation).
    qkv = _linear(x.reshape(B * T, C).astype(compute_dtype), w_attn_c, b_attn_c,
                  out_dtype=compute_dtype)                                   # (B*T, 3C)

    # 2) Head split: one combined transpose for q/k/v; the flash kernel then indexes the
    #    q/k/v planes of the same buffer via its BlockSpec index maps (no per-plane slices).
    tq, T_pad = _attention_tiles(T)
    qkv3 = (qkv.reshape(B, T, 3, H, hd)
               .transpose(2, 0, 3, 1, 4)          # (3, B, H, T, hd)
               .reshape(3 * B * H, T, hd))
    if T_pad != T:
        qkv3 = jnp.pad(qkv3, ((0, 0), (0, T_pad - T), (0, 0)))

    # 3) Flash attention over the lower-triangular block schedule.
    o = _flash_attention(qkv3, tq=tq, out_dtype=compute_dtype)               # (B*H, T_pad, hd)
    o = o[:, :T]

    # 4) Head merge + output projection.
    y = (o.reshape(B, H, T, hd)
          .transpose(0, 2, 1, 3)
          .reshape(B * T, C)
          .astype(compute_dtype))
    out = _linear(y, w_proj_c, b_proj_c, out_dtype=jnp.float32)
    return out.reshape(B, T, C).astype(in_dtype)


# ---------------------------------------------------------------------------
# Pure-JAX reference (dropout = identity) and self-test.
# ---------------------------------------------------------------------------
def _reference(x, w_attn, b_attn, w_proj, b_proj, n_head):
    B, T, C = x.shape
    hd = C // n_head
    qkv = jnp.einsum('btc,oc->bto', x, w_attn) + b_attn           # (B, T, 3C)
    q, k, v = jnp.split(qkv, 3, axis=-1)
    q = q.reshape(B, T, n_head, hd).transpose(0, 2, 1, 3)
    k = k.reshape(B, T, n_head, hd).transpose(0, 2, 1, 3)
    v = v.reshape(B, T, n_head, hd).transpose(0, 2, 1, 3)
    att = jnp.einsum('bhqd,bhkd->bhqk', q, k) / math.sqrt(hd)
    mask = jnp.tril(jnp.ones((T, T), dtype=bool))
    att = jnp.where(mask[None, None], att, -jnp.inf)
    att = jax.nn.softmax(att, axis=-1)
    y = jnp.einsum('bhqk,bhkd->bhqd', att, v)
    y = y.transpose(0, 2, 1, 3).reshape(B, T, C)
    return jnp.einsum('btc,oc->bto', y, w_proj) + b_proj


def _run_case(B, T, C, n_head, compute_dtype, atol, rtol):
    key = jax.random.PRNGKey(0)
    k_x, k_wa, k_ba, k_wp, k_bp = jax.random.split(key, 5)

    x = jax.random.normal(k_x, (B, T, C), dtype=jnp.float32)
    bound = 1.0 / math.sqrt(C)                        # nn.Linear-style init
    w_attn = jax.random.uniform(k_wa, (3 * C, C), minval=-bound, maxval=bound, dtype=jnp.float32)
    b_attn = jax.random.uniform(k_ba, (3 * C,), minval=-bound, maxval=bound, dtype=jnp.float32)
    w_proj = jax.random.uniform(k_wp, (C, C), minval=-bound, maxval=bound, dtype=jnp.float32)
    b_proj = jax.random.uniform(k_bp, (C,), minval=-bound, maxval=bound, dtype=jnp.float32)

    fn = jax.jit(functools.partial(causal_self_attention, n_head=n_head,
                                   compute_dtype=compute_dtype))
    out = jax.block_until_ready(fn(x, w_attn, b_attn, w_proj, b_proj))
    ref = _reference(x, w_attn, b_attn, w_proj, b_proj, n_head)

    assert out.shape == (B, T, C)
    assert jnp.allclose(out, ref, atol=atol, rtol=rtol), (
        f"mismatch vs reference: B={B} T={T} C={C} H={n_head} dtype={compute_dtype}")


if __name__ == "__main__":
    # Module's small config (n_embd=32, n_head=4, block_size=8): single-block path, f32 MXU.
    _run_case(B=2, T=8, C=32, n_head=4, compute_dtype=jnp.float32, atol=5e-3, rtol=5e-3)
    # Tiled config: multi-block triangular grid (tq=256, 2 q-blocks), hd=128, bf16 MXU path.
    _run_case(B=2, T=512, C=256, n_head=2, compute_dtype=jnp.bfloat16, atol=3e-2, rtol=3e-2)
    print("KERNEL_OK")
</pallas_src>

<mosaic_0001>
module attributes {stable_mosaic.version = 11 : i64} {
  func.func @_linear_kernel(%arg0: i32, %arg1: i32, %arg2: i32, %arg3: memref<16x32xf32, #tpu.memory_space<vmem>>, %arg4: memref<96x32xf32, #tpu.memory_space<vmem>>, %arg5: memref<1x96xf32, #tpu.memory_space<vmem>>, %arg6: memref<16x96xf32, #tpu.memory_space<vmem>>, %arg7: memref<16x96xf32, #tpu.memory_space<vmem>>) attributes {dimension_semantics = [#tpu.dimension_semantics<parallel>, #tpu.dimension_semantics<parallel>, #tpu.dimension_semantics<arbitrary>], iteration_bounds = array<i64: 1, 1, 1>, scalar_prefetch = 0 : i64, scratch_operands = 1 : i64, tpu.core_type = #tpu.core_type<tc>, window_params = [{transform_indices = @transform_0, window_bounds = array<i64: 16, 32>}, {transform_indices = @transform_1, window_bounds = array<i64: 96, 32>}, {transform_indices = @transform_2, window_bounds = array<i64: 1, 96>}, {transform_indices = @transform_3, window_bounds = array<i64: 16, 96>}]} {
    %c0_i32 = arith.constant 0 : i32
    %0 = arith.cmpi eq, %arg2, %c0_i32 : i32
    %1 = arith.extui %0 : i1 to i32
    %c0_i32_0 = arith.constant 0 : i32
    %2 = arith.cmpi ne, %1, %c0_i32_0 : i32
    scf.if %2 {
      %cst_10 = arith.constant 0.000000e+00 : f32
      %12 = vector.broadcast %cst_10 : f32 to vector<16x96xf32>
      %c0_11 = arith.constant 0 : index
      %c0_12 = arith.constant 0 : index
      %13 = vector.load %arg7[%c0_11, %c0_12] : memref<16x96xf32, #tpu.memory_space<vmem>>, vector<16x96xf32>
      tpu.vector_store %arg7[%c0_11, %c0_12], %12 {strides = array<i32>} : memref<16x96xf32, #tpu.memory_space<vmem>>, vector<16x96xf32>,
    } else {
    }
    %c0 = arith.constant 0 : index
    %c0_1 = arith.constant 0 : index
    %3 = vector.load %arg7[%c0, %c0_1] : memref<16x96xf32, #tpu.memory_space<vmem>>, vector<16x96xf32>
    %c0_2 = arith.constant 0 : index
    %c0_3 = arith.constant 0 : index
    %4 = vector.load %arg3[%c0_2, %c0_3] : memref<16x32xf32, #tpu.memory_space<vmem>>, vector<16x32xf32>
    %c0_4 = arith.constant 0 : index
    %c0_5 = arith.constant 0 : index
    %5 = vector.load %arg4[%c0_4, %c0_5] : memref<96x32xf32, #tpu.memory_space<vmem>>, vector<96x32xf32>
    %cst = arith.constant dense<0.000000e+00> : vector<16x96xf32>
    %6 = tpu.matmul %4, %5, %cst {dimension_numbers = #tpu.dot_dimension_numbers<[1], [1], [0], [0], [0, 0, 1, 0], [], []>} : vector<16x32xf32>, vector<96x32xf32>, vector<16x96xf32> -> vector<16x96xf32>
    %7 = arith.addf %3, %6 : vector<16x96xf32>
    %c0_6 = arith.constant 0 : index
    %c0_7 = arith.constant 0 : index
    %8 = vector.load %arg7[%c0_6, %c0_7] : memref<16x96xf32, #tpu.memory_space<vmem>>, vector<16x96xf32>
    tpu.vector_store %arg7[%c0_6, %c0_7], %7 {strides = array<i32>} : memref<16x96xf32, #tpu.memory_space<vmem>>, vector<16x96xf32>,
    %c0_i32_8 = arith.constant 0 : i32
    %9 = arith.cmpi eq, %arg2, %c0_i32_8 : i32
    %10 = arith.extui %9 : i1 to i32
    %c0_i32_9 = arith.constant 0 : i32
    %11 = arith.cmpi ne, %10, %c0_i32_9 : i32
    scf.if %11 {
      %c0_10 = arith.constant 0 : index
      %c0_11 = arith.constant 0 : index
      %12 = vector.load %arg7[%c0_10, %c0_11] : memref<16x96xf32, #tpu.memory_space<vmem>>, vector<16x96xf32>
      %c0_12 = arith.constant 0 : index
      %c0_13 = arith.constant 0 : index
      %13 = vector.load %arg5[%c0_12, %c0_13] : memref<1x96xf32, #tpu.memory_space<vmem>>, vector<1x96xf32>
      %14 = vector.broadcast %13 : vector<1x96xf32> to vector<16x96xf32>
      %15 = arith.addf %12, %14 : vector<16x96xf32>
      %c0_14 = arith.constant 0 : index
      %c0_15 = arith.constant 0 : index
      %16 = vector.load %arg6[%c0_14, %c0_15] : memref<16x96xf32, #tpu.memory_space<vmem>>, vector<16x96xf32>
      tpu.vector_store %arg6[%c0_14, %c0_15], %15 {strides = array<i32>} : memref<16x96xf32, #tpu.memory_space<vmem>>, vector<16x96xf32>,
    } else {
    }
    return
  }
  func.func @transform_0(%arg0: i32, %arg1: i32, %arg2: i32) -> (i32, i32) {
    %c0_i32 = arith.constant 0 : i32
    return %arg0, %arg2 : i32, i32
  }
  func.func @transform_1(%arg0: i32, %arg1: i32, %arg2: i32) -> (i32, i32) {
    %c0_i32 = arith.constant 0 : i32
    return %arg1, %arg2 : i32, i32
  }
  func.func @transform_2(%arg0: i32, %arg1: i32, %arg2: i32) -> (i32, i32) {
    %c0_i32 = arith.constant 0 : i32
    %c0_i32_0 = arith.constant 0 : i32
    return %c0_i32, %arg1 : i32, i32
  }
  func.func @transform_3(%arg0: i32, %arg1: i32, %arg2: i32) -> (i32, i32) {
    %c0_i32 = arith.constant 0 : i32
    return %arg0, %arg1 : i32, i32
  }
}

module attributes {stable_mosaic.version = 11 : i64} {
  func.func @_flash_tri_kernel(%arg0: i32, %arg1: i32, %arg2: memref<1xi32, #tpu.memory_space<smem>>, %arg3: memref<1xi32, #tpu.memory_space<smem>>, %arg4: memref<1x8x8xf32, #tpu.memory_space<vmem>>, %arg5: memref<1x8x8xf32, #tpu.memory_space<vmem>>, %arg6: memref<1x8x8xf32, #tpu.memory_space<vmem>>, %arg7: memref<1x8x8xf32, #tpu.memory_space<vmem>>, %arg8: memref<8x1xf32, #tpu.memory_space<vmem>>, %arg9: memref<8x1xf32, #tpu.memory_space<vmem>>, %arg10: memref<8x8xf32, #tpu.memory_space<vmem>>) attributes {dimension_semantics = [#tpu.dimension_semantics<parallel>, #tpu.dimension_semantics<arbitrary>], iteration_bounds = array<i64: 8, 1>, scalar_prefetch = 2 : i64, scratch_operands = 3 : i64, tpu.core_type = #tpu.core_type<tc>, window_params = [{transform_indices = @transform_0, window_bounds = array<i64: 1, 8, 8>}, {transform_indices = @transform_1, window_bounds = array<i64: 1, 8, 8>}, {transform_indices = @transform_2, window_bounds = array<i64: 1, 8, 8>}, {transform_indices = @transform_3, window_bounds = array<i64: 1, 8, 8>}]} {
    %0 = arith.index_cast %arg1 : i32 to index
    %1 = memref.load %arg2[%0] : memref<1xi32, #tpu.memory_space<smem>>
    %2 = arith.index_cast %arg1 : i32 to index
    %3 = memref.load %arg3[%2] : memref<1xi32, #tpu.memory_space<smem>>
    %c0_i32 = arith.constant 0 : i32
    %4 = arith.cmpi eq, %3, %c0_i32 : i32
    %5 = arith.extui %4 : i1 to i32
    %c0_i32_0 = arith.constant 0 : i32
    %6 = arith.cmpi ne, %5, %c0_i32_0 : i32
    scf.if %6 {
      %cst = arith.constant 0xFF800000 : f32
      %13 = vector.broadcast %cst : f32 to vector<8x1xf32>
      %c0 = arith.constant 0 : index
      %c0_3 = arith.constant 0 : index
      %14 = vector.load %arg8[%c0, %c0_3] : memref<8x1xf32, #tpu.memory_space<vmem>>, vector<8x1xf32>
      tpu.vector_store %arg8[%c0, %c0_3], %13 {strides = array<i32>} : memref<8x1xf32, #tpu.memory_space<vmem>>, vector<8x1xf32>,
      %cst_4 = arith.constant 0.000000e+00 : f32
      %15 = vector.broadcast %cst_4 : f32 to vector<8x1xf32>
      %c0_5 = arith.constant 0 : index
      %c0_6 = arith.constant 0 : index
      %16 = vector.load %arg9[%c0_5, %c0_6] : memref<8x1xf32, #tpu.memory_space<vmem>>, vector<8x1xf32>
      tpu.vector_store %arg9[%c0_5, %c0_6], %15 {strides = array<i32>} : memref<8x1xf32, #tpu.memory_space<vmem>>, vector<8x1xf32>,
      %cst_7 = arith.constant 0.000000e+00 : f32
      %17 = vector.broadcast %cst_7 : f32 to vector<8x8xf32>
      %c0_8 = arith.constant 0 : index
      %c0_9 = arith.constant 0 : index
      %18 = vector.load %arg10[%c0_8, %c0_9] : memref<8x8xf32, #tpu.memory_space<vmem>>, vector<8x8xf32>
      tpu.vector_store %arg10[%c0_8, %c0_9], %17 {strides = array<i32>} : memref<8x8xf32, #tpu.memory_space<vmem>>, vector<8x8xf32>,
    } else {
    }
    %7 = arith.cmpi slt, %3, %1 : i32
    %8 = arith.extui %7 : i1 to i32
    %c0_i32_1 = arith.constant 0 : i32
    %9 = arith.cmpi ne, %8, %c0_i32_1 : i32
    scf.if %9 {
      %c0 = arith.constant 0 : index
      %c0_3 = arith.constant 0 : index
      %c0_4 = arith.constant 0 : index
      %13 = vector.load %arg4[%c0, %c0_3, %c0_4] : memref<1x8x8xf32, #tpu.memory_space<vmem>>, vector<1x8x8xf32>
      %14 = vector.shape_cast %13 : vector<1x8x8xf32> to vector<8x8xf32>
      %c0_5 = arith.constant 0 : index
      %c0_6 = arith.constant 0 : index
      %c0_7 = arith.constant 0 : index
      %15 = vector.load %arg5[%c0_5, %c0_6, %c0_7] : memref<1x8x8xf32, #tpu.memory_space<vmem>>, vector<1x8x8xf32>
      %16 = vector.shape_cast %15 : vector<1x8x8xf32> to vector<8x8xf32>
      %cst = arith.constant dense<0.000000e+00> : vector<8x8xf32>
      %17 = tpu.matmul %14, %16, %cst {dimension_numbers = #tpu.dot_dimension_numbers<[1], [1], [0], [0], [0, 0, 1, 0], [], []>} : vector<8x8xf32>, vector<8x8xf32>, vector<8x8xf32> -> vector<8x8xf32>
      %c0_8 = arith.constant 0 : index
      %c0_9 = arith.constant 0 : index
      %18 = vector.load %arg8[%c0_8, %c0_9] : memref<8x1xf32, #tpu.memory_space<vmem>>, vector<8x1xf32>
      %cst_10 = arith.constant dense<0xFF800000> : vector<8xf32>
      %19 = vector.multi_reduction <maximumf>, %17, %cst_10 [1] : vector<8x8xf32> to vector<8xf32>
      %20 = vector.shape_cast %19 : vector<8xf32> to vector<8x1xf32>
      %21 = arith.maximumf %18, %20 : vector<8x1xf32>
      %22 = arith.subf %18, %21 : vector<8x1xf32>
      %23 = math.exp %22 : vector<8x1xf32>
      %24 = vector.broadcast %21 : vector<8x1xf32> to vector<8x8xf32>
      %25 = arith.subf %17, %24 : vector<8x8xf32>
      %26 = math.exp %25 : vector<8x8xf32>
      %c0_11 = arith.constant 0 : index
      %c0_12 = arith.constant 0 : index
      %27 = vector.load %arg9[%c0_11, %c0_12] : memref<8x1xf32, #tpu.memory_space<vmem>>, vector<8x1xf32>
      %28 = arith.mulf %23, %27 : vector<8x1xf32>
      %cst_13 = arith.constant dense<0.000000e+00> : vector<8xf32>
      %29 = vector.multi_reduction <add>, %26, %cst_13 [1] : vector<8x8xf32> to vector<8xf32>
      %30 = vector.shape_cast %29 : vector<8xf32> to vector<8x1xf32>
      %31 = arith.addf %28, %30 : vector<8x1xf32>
      %c0_14 = arith.constant 0 : index
      %c0_15 = arith.constant 0 : index
      %32 = vector.load %arg9[%c0_14, %c0_15] : memref<8x1xf32, #tpu.memory_space<vmem>>, vector<8x1xf32>
      tpu.vector_store %arg9[%c0_14, %c0_15], %31 {strides = array<i32>} : memref<8x1xf32, #tpu.memory_space<vmem>>, vector<8x1xf32>,
      %c0_16 = arith.constant 0 : index
      %c0_17 = arith.constant 0 : index
      %33 = vector.load %arg10[%c0_16, %c0_17] : memref<8x8xf32, #tpu.memory_space<vmem>>, vector<8x8xf32>
      %34 = vector.broadcast %23 : vector<8x1xf32> to vector<8x8xf32>
      %35 = arith.mulf %34, %33 : vector<8x8xf32>
      %c0_18 = arith.constant 0 : index
      %c0_19 = arith.constant 0 : index
      %c0_20 = arith.constant 0 : index
      %36 = vector.load %arg6[%c0_18, %c0_19, %c0_20] : memref<1x8x8xf32, #tpu.memory_space<vmem>>, vector<1x8x8xf32>
      %37 = vector.shape_cast %36 : vector<1x8x8xf32> to vector<8x8xf32>
      %cst_21 = arith.constant dense<0.000000e+00> : vector<8x8xf32>
      %38 = tpu.matmul %26, %37, %cst_21 {dimension_numbers = #tpu.dot_dimension_numbers<[1], [0], [0], [1], [0, 0, 1, 1], [], []>} : vector<8x8xf32>, vector<8x8xf32>, vector<8x8xf32> -> vector<8x8xf32>
      %39 = arith.addf %35, %38 : vector<8x8xf32>
      %c0_22 = arith.constant 0 : index
      %c0_23 = arith.constant 0 : index
      %40 = vector.load %arg10[%c0_22, %c0_23] : memref<8x8xf32, #tpu.memory_space<vmem>>, vector<8x8xf32>
      tpu.vector_store %arg10[%c0_22, %c0_23], %39 {strides = array<i32>} : memref<8x8xf32, #tpu.memory_space<vmem>>, vector<8x8xf32>,
      %c0_24 = arith.constant 0 : index
      %c0_25 = arith.constant 0 : index
      %41 = vector.load %arg8[%c0_24, %c0_25] : memref<8x1xf32, #tpu.memory_space<vmem>>, vector<8x1xf32>
      tpu.vector_store %arg8[%c0_24, %c0_25], %21 {strides = array<i32>} : memref<8x1xf32, #tpu.memory_space<vmem>>, vector<8x1xf32>,
    } else {
    }
    %10 = arith.cmpi eq, %3, %1 : i32
    %11 = arith.extui %10 : i1 to i32
    %c0_i32_2 = arith.constant 0 : i32
    %12 = arith.cmpi ne, %11, %c0_i32_2 : i32
    scf.if %12 {
      %c0 = arith.constant 0 : index
      %c0_3 = arith.constant 0 : index
      %c0_4 = arith.constant 0 : index
      %13 = vector.load %arg4[%c0, %c0_3, %c0_4] : memref<1x8x8xf32, #tpu.memory_space<vmem>>, vector<1x8x8xf32>
      %14 = vector.shape_cast %13 : vector<1x8x8xf32> to vector<8x8xf32>
      %c0_5 = arith.constant 0 : index
      %c0_6 = arith.constant 0 : index
      %c0_7 = arith.constant 0 : index
      %15 = vector.load %arg5[%c0_5, %c0_6, %c0_7] : memref<1x8x8xf32, #tpu.memory_space<vmem>>, vector<1x8x8xf32>
      %16 = vector.shape_cast %15 : vector<1x8x8xf32> to vector<8x8xf32>
      %cst = arith.constant dense<0.000000e+00> : vector<8x8xf32>
      %17 = tpu.matmul %14, %16, %cst {dimension_numbers = #tpu.dot_dimension_numbers<[1], [1], [0], [0], [0, 0, 1, 0], [], []>} : vector<8x8xf32>, vector<8x8xf32>, vector<8x8xf32> -> vector<8x8xf32>
      %c8_i32 = arith.constant 8 : i32
      %18 = arith.muli %1, %c8_i32 : i32
      %19 = tpu.iota {dimensions = array<i32: 0>} : vector<8x8xi32>
      %20 = vector.broadcast %18 : i32 to vector<8x8xi32>
      %21 = arith.addi %20, %19 : vector<8x8xi32>
      %c8_i32_8 = arith.constant 8 : i32
      %22 = arith.muli %3, %c8_i32_8 : i32
      %23 = tpu.iota {dimensions = array<i32: 1>} : vector<8x8xi32>
      %24 = vector.broadcast %22 : i32 to vector<8x8xi32>
      %25 = arith.addi %24, %23 : vector<8x8xi32>
      %26 = arith.cmpi sge, %21, %25 : vector<8x8xi32>
      %cst_9 = arith.constant -1.000000e+30 : f32
      %27 = vector.broadcast %cst_9 : f32 to vector<8x8xf32>
      %28 = arith.select %26, %17, %27 : vector<8x8xi1>, vector<8x8xf32>
      %c0_10 = arith.constant 0 : index
      %c0_11 = arith.constant 0 : index
      %29 = vector.load %arg8[%c0_10, %c0_11] : memref<8x1xf32, #tpu.memory_space<vmem>>, vector<8x1xf32>
      %cst_12 = arith.constant dense<0xFF800000> : vector<8xf32>
      %30 = vector.multi_reduction <maximumf>, %28, %cst_12 [1] : vector<8x8xf32> to vector<8xf32>
      %31 = vector.shape_cast %30 : vector<8xf32> to vector<8x1xf32>
      %32 = arith.maximumf %29, %31 : vector<8x1xf32>
      %33 = arith.subf %29, %32 : vector<8x1xf32>
      %34 = math.exp %33 : vector<8x1xf32>
      %35 = vector.broadcast %32 : vector<8x1xf32> to vector<8x8xf32>
      %36 = arith.subf %28, %35 : vector<8x8xf32>
      %37 = math.exp %36 : vector<8x8xf32>
      %c0_13 = arith.constant 0 : index
      %c0_14 = arith.constant 0 : index
      %38 = vector.load %arg9[%c0_13, %c0_14] : memref<8x1xf32, #tpu.memory_space<vmem>>, vector<8x1xf32>
      %39 = arith.mulf %34, %38 : vector<8x1xf32>
      %cst_15 = arith.constant dense<0.000000e+00> : vector<8xf32>
      %40 = vector.multi_reduction <add>, %37, %cst_15 [1] : vector<8x8xf32> to vector<8xf32>
      %41 = vector.shape_cast %40 : vector<8xf32> to vector<8x1xf32>
      %42 = arith.addf %39, %41 : vector<8x1xf32>
      %c0_16 = arith.constant 0 : index
      %c0_17 = arith.constant 0 : index
      %43 = vector.load %arg9[%c0_16, %c0_17] : memref<8x1xf32, #tpu.memory_space<vmem>>, vector<8x1xf32>
      tpu.vector_store %arg9[%c0_16, %c0_17], %42 {strides = array<i32>} : memref<8x1xf32, #tpu.memory_space<vmem>>, vector<8x1xf32>,
      %c0_18 = arith.constant 0 : index
      %c0_19 = arith.constant 0 : index
      %44 = vector.load %arg10[%c0_18, %c0_19] : memref<8x8xf32, #tpu.memory_space<vmem>>, vector<8x8xf32>
      %45 = vector.broadcast %34 : vector<8x1xf32> to vector<8x8xf32>
      %46 = arith.mulf %45, %44 : vector<8x8xf32>
      %c0_20 = arith.constant 0 : index
      %c0_21 = arith.constant 0 : index
      %c0_22 = arith.constant 0 : index
      %47 = vector.load %arg6[%c0_20, %c0_21, %c0_22] : memref<1x8x8xf32, #tpu.memory_space<vmem>>, vector<1x8x8xf32>
      %48 = vector.shape_cast %47 : vector<1x8x8xf32> to vector<8x8xf32>
      %cst_23 = arith.constant dense<0.000000e+00> : vector<8x8xf32>
      %49 = tpu.matmul %37, %48, %cst_23 {dimension_numbers = #tpu.dot_dimension_numbers<[1], [0], [0], [1], [0, 0, 1, 1], [], []>} : vector<8x8xf32>, vector<8x8xf32>, vector<8x8xf32> -> vector<8x8xf32>
      %50 = arith.addf %46, %49 : vector<8x8xf32>
      %c0_24 = arith.constant 0 : index
      %c0_25 = arith.constant 0 : index
      %51 = vector.load %arg10[%c0_24, %c0_25] : memref<8x8xf32, #tpu.memory_space<vmem>>, vector<8x8xf32>
      tpu.vector_store %arg10[%c0_24, %c0_25], %50 {strides = array<i32>} : memref<8x8xf32, #tpu.memory_space<vmem>>, vector<8x8xf32>,
      %c0_26 = arith.constant 0 : index
      %c0_27 = arith.constant 0 : index
      %52 = vector.load %arg8[%c0_26, %c0_27] : memref<8x1xf32, #tpu.memory_space<vmem>>, vector<8x1xf32>
      tpu.vector_store %arg8[%c0_26, %c0_27], %32 {strides = array<i32>} : memref<8x1xf32, #tpu.memory_space<vmem>>, vector<8x1xf32>,
      %c0_28 = arith.constant 0 : index
      %c0_29 = arith.constant 0 : index
      %53 = vector.load %arg9[%c0_28, %c0_29] : memref<8x1xf32, #tpu.memory_space<vmem>>, vector<8x1xf32>
      %54 = tpu.reciprocal %53 {approx = true} : vector<8x1xf32> -> vector<8x1xf32>
      %c0_30 = arith.constant 0 : index
      %c0_31 = arith.constant 0 : index
      %55 = vector.load %arg10[%c0_30, %c0_31] : memref<8x8xf32, #tpu.memory_space<vmem>>, vector<8x8xf32>
      %56 = vector.broadcast %54 : vector<8x1xf32> to vector<8x8xf32>
      %57 = arith.mulf %55, %56 : vector<8x8xf32>
      %c0_32 = arith.constant 0 : index
      %c0_33 = arith.constant 0 : index
      %c0_34 = arith.constant 0 : index
      %58 = vector.load %arg7[%c0_32, %c0_33, %c0_34] : memref<1x8x8xf32, #tpu.memory_space<vmem>>, vector<1x8x8xf32>
      %59 = vector.shape_cast %58 : vector<1x8x8xf32> to vector<8x8xf32>
      %60 = vector.shape_cast %57 : vector<8x8xf32> to vector<1x8x8xf32>
      tpu.vector_store %arg7[%c0_32, %c0_33, %c0_34], %60 {strides = array<i32>} : memref<1x8x8xf32, #tpu.memory_space<vmem>>, vector<1x8x8xf32>,
    } else {
    }
    return
  }
  func.func @transform_0(%arg0: i32, %arg1: i32, %arg2: memref<1xi32, #tpu.memory_space<smem>>, %arg3: memref<1xi32, #tpu.memory_space<smem>>) -> (i32, i32, i32) {
    %0 = arith.index_cast %arg1 : i32 to index
    %1 = memref.load %arg2[%0] : memref<1xi32, #tpu.memory_space<smem>>
    %c0_i32 = arith.constant 0 : i32
    %c0_i32_0 = arith.constant 0 : i32
    return %arg0, %1, %c0_i32 : i32, i32, i32
  }
  func.func @transform_1(%arg0: i32, %arg1: i32, %arg2: memref<1xi32, #tpu.memory_space<smem>>, %arg3: memref<1xi32, #tpu.memory_space<smem>>) -> (i32, i32, i32) {
    %c8_i32 = arith.constant 8 : i32
    %0 = arith.addi %c8_i32, %arg0 : i32
    %1 = arith.index_cast %arg1 : i32 to index
    %2 = memref.load %arg3[%1] : memref<1xi32, #tpu.memory_space<smem>>
    %c0_i32 = arith.constant 0 : i32
    %c0_i32_0 = arith.constant 0 : i32
    return %0, %2, %c0_i32 : i32, i32, i32
  }
  func.func @transform_2(%arg0: i32, %arg1: i32, %arg2: memref<1xi32, #tpu.memory_space<smem>>, %arg3: memref<1xi32, #tpu.memory_space<smem>>) -> (i32, i32, i32) {
    %c16_i32 = arith.constant 16 : i32
    %0 = arith.addi %c16_i32, %arg0 : i32
    %1 = arith.index_cast %arg1 : i32 to index
    %2 = memref.load %arg3[%1] : memref<1xi32, #tpu.memory_space<smem>>
    %c0_i32 = arith.constant 0 : i32
    %c0_i32_0 = arith.constant 0 : i32
    return %0, %2, %c0_i32 : i32, i32, i32
  }
  func.func @transform_3(%arg0: i32, %arg1: i32, %arg2: memref<1xi32, #tpu.memory_space<smem>>, %arg3: memref<1xi32, #tpu.memory_space<smem>>) -> (i32, i32, i32) {
    %0 = arith.index_cast %arg1 : i32 to index
    %1 = memref.load %arg2[%0] : memref<1xi32, #tpu.memory_space<smem>>
    %c0_i32 = arith.constant 0 : i32
    %c0_i32_0 = arith.constant 0 : i32
    return %arg0, %1, %c0_i32 : i32, i32, i32
  }
}

module attributes {stable_mosaic.version = 11 : i64} {
  func.func @_linear_kernel(%arg0: i32, %arg1: i32, %arg2: i32, %arg3: memref<16x32xf32, #tpu.memory_space<vmem>>, %arg4: memref<32x32xf32, #tpu.memory_space<vmem>>, %arg5: memref<1x32xf32, #tpu.memory_space<vmem>>, %arg6: memref<16x32xf32, #tpu.memory_space<vmem>>, %arg7: memref<16x32xf32, #tpu.memory_space<vmem>>) attributes {dimension_semantics = [#tpu.dimension_semantics<parallel>, #tpu.dimension_semantics<parallel>, #tpu.dimension_semantics<arbitrary>], iteration_bounds = array<i64: 1, 1, 1>, scalar_prefetch = 0 : i64, scratch_operands = 1 : i64, tpu.core_type = #tpu.core_type<tc>, window_params = [{transform_indices = @transform_0, window_bounds = array<i64: 16, 32>}, {transform_indices = @transform_1, window_bounds = array<i64: 32, 32>}, {transform_indices = @transform_2, window_bounds = array<i64: 1, 32>}, {transform_indices = @transform_3, window_bounds = array<i64: 16, 32>}]} {
    %c0_i32 = arith.constant 0 : i32
    %0 = arith.cmpi eq, %arg2, %c0_i32 : i32
    %1 = arith.extui %0 : i1 to i32
    %c0_i32_0 = arith.constant 0 : i32
    %2 = arith.cmpi ne, %1, %c0_i32_0 : i32
    scf.if %2 {
      %cst_10 = arith.constant 0.000000e+00 : f32
      %12 = vector.broadcast %cst_10 : f32 to vector<16x32xf32>
      %c0_11 = arith.constant 0 : index
      %c0_12 = arith.constant 0 : index
      %13 = vector.load %arg7[%c0_11, %c0_12] : memref<16x32xf32, #tpu.memory_space<vmem>>, vector<16x32xf32>
      tpu.vector_store %arg7[%c0_11, %c0_12], %12 {strides = array<i32>} : memref<16x32xf32, #tpu.memory_space<vmem>>, vector<16x32xf32>,
    } else {
    }
    %c0 = arith.constant 0 : index
    %c0_1 = arith.constant 0 : index
    %3 = vector.load %arg7[%c0, %c0_1] : memref<16x32xf32, #tpu.memory_space<vmem>>, vector<16x32xf32>
    %c0_2 = arith.constant 0 : index
    %c0_3 = arith.constant 0 : index
    %4 = vector.load %arg3[%c0_2, %c0_3] : memref<16x32xf32, #tpu.memory_space<vmem>>, vector<16x32xf32>
    %c0_4 = arith.constant 0 : index
    %c0_5 = arith.constant 0 : index
    %5 = vector.load %arg4[%c0_4, %c0_5] : memref<32x32xf32, #tpu.memory_space<vmem>>, vector<32x32xf32>
    %cst = arith.constant dense<0.000000e+00> : vector<16x32xf32>
    %6 = tpu.matmul %4, %5, %cst {dimension_numbers = #tpu.dot_dimension_numbers<[1], [1], [0], [0], [0, 0, 1, 0], [], []>} : vector<16x32xf32>, vector<32x32xf32>, vector<16x32xf32> -> vector<16x32xf32>
    %7 = arith.addf %3, %6 : vector<16x32xf32>
    %c0_6 = arith.constant 0 : index
    %c0_7 = arith.constant 0 : index
    %8 = vector.load %arg7[%c0_6, %c0_7] : memref<16x32xf32, #tpu.memory_space<vmem>>, vector<16x32xf32>
    tpu.vector_store %arg7[%c0_6, %c0_7], %7 {strides = array<i32>} : memref<16x32xf32, #tpu.memory_space<vmem>>, vector<16x32xf32>,
    %c0_i32_8 = arith.constant 0 : i32
    %9 = arith.cmpi eq, %arg2, %c0_i32_8 : i32
    %10 = arith.extui %9 : i1 to i32
    %c0_i32_9 = arith.constant 0 : i32
    %11 = arith.cmpi ne, %10, %c0_i32_9 : i32
    scf.if %11 {
      %c0_10 = arith.constant 0 : index
      %c0_11 = arith.constant 0 : index
      %12 = vector.load %arg7[%c0_10, %c0_11] : memref<16x32xf32, #tpu.memory_space<vmem>>, vector<16x32xf32>
      %c0_12 = arith.constant 0 : index
      %c0_13 = arith.constant 0 : index
      %13 = vector.load %arg5[%c0_12, %c0_13] : memref<1x32xf32, #tpu.memory_space<vmem>>, vector<1x32xf32>
      %14 = vector.broadcast %13 : vector<1x32xf32> to vector<16x32xf32>
      %15 = arith.addf %12, %14 : vector<16x32xf32>
      %c0_14 = arith.constant 0 : index
      %c0_15 = arith.constant 0 : index
      %16 = vector.load %arg6[%c0_14, %c0_15] : memref<16x32xf32, #tpu.memory_space<vmem>>, vector<16x32xf32>
      tpu.vector_store %arg6[%c0_14, %c0_15], %15 {strides = array<i32>} : memref<16x32xf32, #tpu.memory_space<vmem>>, vector<16x32xf32>,
    } else {
    }
    return
  }
  func.func @transform_0(%arg0: i32, %arg1: i32, %arg2: i32) -> (i32, i32) {
    %c0_i32 = arith.constant 0 : i32
    return %arg0, %arg2 : i32, i32
  }
  func.func @transform_1(%arg0: i32, %arg1: i32, %arg2: i32) -> (i32, i32) {
    %c0_i32 = arith.constant 0 : i32
    return %arg1, %arg2 : i32, i32
  }
  func.func @transform_2(%arg0: i32, %arg1: i32, %arg2: i32) -> (i32, i32) {
    %c0_i32 = arith.constant 0 : i32
    %c0_i32_0 = arith.constant 0 : i32
    return %c0_i32, %arg1 : i32, i32
  }
  func.func @transform_3(%arg0: i32, %arg1: i32, %arg2: i32) -> (i32, i32) {
    %c0_i32 = arith.constant 0 : i32
    return %arg0, %arg1 : i32, i32
  }
}

</mosaic_0001>

<bundles_post_ra>
// kernel: causal_self_attention.3
= control target key start
LH: loop header
LB: loop body
LE: loop exit
PB: predicated region body
PF: predicated region fallthrough
CT: control target
= control target key end

     0   :  { %vm37_vm0 = vcmask 261120   ;;  %vm18_vm1 = vcmask 785408   ;;  %v273_v3 = vmov 0.0   ;;  %s383_s1 = inlined_call_operand.vmem [shape: f32[96,32], index: 1, kind: input, shape index: {}]   ;;  %s384_s0 = inlined_call_operand.vmem [shape: f32[16,32], index: 0, kind: input, shape index: {}]   ;;  %s385_s2 = inlined_call_operand.vmem [shape: f32[1,96], index: 2, kind: input, shape index: {}]   ;;  %s386_s3 = inlined_call_operand.vmem [shape: f32[16,96], index: 3, kind: output, shape index: {}]  }
   0x1   :  { %v25_v0 = vld [vmem:[%s383_s1] sm:$0xff]  ;;  %v26_v1 = vld [vmem:[%s383_s1 + $0x8] sm:$0xff]  ;;  %vm302_vm2 = vmpackc.low %vm37_vm0, %vm37_vm0  ;;  %20 = vst.msk [vmem:[#allocation2 + $0x8] sm:$0xff] %vm18_vm1, %v273_v3 }
   0x2   :  { %19 = vst.msk [vmem:[#allocation2] sm:$0xff] %vm18_vm1, %v273_v3  ;;  %v236_v4 = vpack.c.bf16 %v26_v1, %v25_v0  ;;  %v27_v5 = vld [vmem:[%s383_s1 + $0x10] sm:$0xff]  ;;  %v28_v6 = vld [vmem:[%s383_s1 + $0x18] sm:$0xff]  ;;  %v23_v8 = vld [vmem:[%s384_s0] sm:$0xff] }
   0x3   :  { %v242_v7 = vpack.c.bf16 %v28_v6, %v27_v5  ;;  %233 = vmatprep.mubr.msk.f32.mxu0 %vm37_vm0, %v23_v8  ;;  %v29_v9 = vld [vmem:[%s383_s1 + $0x20] sm:$0xff]  ;;  %v30_v10 = vld [vmem:[%s383_s1 + $0x28] sm:$0xff]  ;;  %v31_v12 = vld [vmem:[%s383_s1 + $0x30] sm:$0xff] }
   0x4   :  { %238 = vmatprep.subr.msk.bf16.mxu0 %vm302_vm2, %v236_v4  ;;  %v248_v11 = vpack.c.bf16 %v30_v10, %v29_v9  ;;  %v32_v13 = vld [vmem:[%s383_s1 + $0x38] sm:$0xff]  ;;  %v33_v15 = vld [vmem:[%s383_s1 + $0x40] sm:$0xff]  ;;  %v34_v16 = vld [vmem:[%s383_s1 + $0x48] sm:$0xff] }
   0x5   :  { %241 = vmatpush3.bf16.xpose.msk.msra.mxu0 %vm302_vm2, %v236_v4  ;;  %v254_v14 = vpack.c.bf16 %v32_v13, %v31_v12  ;;  %v260_v17 = vpack.c.bf16 %v34_v16, %v33_v15  ;;  %v35_v18 = vld [vmem:[%s383_s1 + $0x50] sm:$0xff]  ;;  %v36_v19 = vld [vmem:[%s383_s1 + $0x58] sm:$0xff]  ;;  %v24_v21 = vld [vmem:[%s384_s0 + $0x8] sm:$0xff] }
   0x6   :  { %244 = vmatprep.subr.msk.bf16.mxu0 %vm302_vm2, %v242_v7  ;;  %v266_v20 = vpack.c.bf16 %v36_v19, %v35_v18  ;;  %v194_v28 = vld [vmem:[%s385_s2] ss:$0 sm:$0xff] }
   0x8   :  { %v22_v22 = vld [vmem:[#allocation2 + $0x8] sm:$0xff] }
   0x9   :  { %v21_v23 = vld [vmem:[#allocation2] sm:$0xff] }
   0xd   :  { %247 = vmatpush3.bf16.xpose.msk.msra.mxu0 %vm302_vm2, %v242_v7 }
   0xe   :  { %250 = vmatprep.subr.msk.bf16.mxu0 %vm302_vm2, %v248_v11 }
  0x15   :  { %253 = vmatpush3.bf16.xpose.msk.msra.mxu0 %vm302_vm2, %v248_v11 }
  0x16   :  { %256 = vmatprep.subr.msk.bf16.mxu0 %vm302_vm2, %v254_v14 }
  0x1d   :  { %259 = vmatpush3.bf16.xpose.msk.msra.mxu0 %vm302_vm2, %v254_v14 }
  0x1e   :  { %262 = vmatprep.subr.msk.bf16.mxu0 %vm302_vm2, %v260_v17 }
  0x25   :  { %265 = vmatpush3.bf16.xpose.msk.msra.mxu0 %vm302_vm2, %v260_v17 }
  0x26   :  { %268 = vmatprep.subr.msk.bf16.mxu0 %vm302_vm2, %v266_v20 }
  0x2d   :  { %271 = vmatpush3.bf16.xpose.msk.msra.mxu0 %vm302_vm2, %v266_v20 }
  0x34   :  { %234 = vmatmul.mubr.msk.f32.vlgmr.msra.gmra.mrb[0].mxu0 %vm37_vm0, %v24_v21 }
 0x107   :  { %v235_v24 = vpop.f32.mrb[0].mxu0 }
 0x108   :  { %v156_v25 = vadd.f32 %v235_v24, %v22_v22  ;;  %v146_v26 = vpop.f32.mrb[1].mxu0 }
 0x109   :  { %v155_v27 = vadd.f32 %v146_v26, %v21_v23 }
 0x10a   :  { %159 = vst.msk [vmem:[#allocation2 + $0x8] sm:$0xff] %vm18_vm1, %v156_v25 }
 0x10b   :  { %158 = vst.msk [vmem:[#allocation2] sm:$0xff] %vm18_vm1, %v155_v27 }
 0x111   :  { %v164_v29 = vld [vmem:[#allocation2 + $0x8] sm:$0xff] }
 0x112   :  { %v173_v30 = vadd.f32 %v194_v28, %v164_v29  ;;  %v163_v31 = vld [vmem:[#allocation2] sm:$0xff] }
 0x113   :  { %v172_v32 = vadd.f32 %v194_v28, %v163_v31 }
 0x114   :  { %175 = vst.msk [vmem:[%s386_s3 + $0x8] sm:$0xff] %vm18_vm1, %v173_v30 }
 0x115   :  { %174 = vst.msk [vmem:[%s386_s3] sm:$0xff] %vm18_vm1, %v172_v32 }

// kernel: causal_self_attention.5
= control target key start
LH: loop header
LB: loop body
LE: loop exit
PB: predicated region body
PF: predicated region fallthrough
CT: control target
= control target key end

     0   :  { %vm19_vm0 = vcmask 261120   ;;  %v224_v6 = vmov 0.0   ;;  %s291_s0 = inlined_call_operand.vmem [shape: f32[16,32], index: 0, kind: input, shape index: {}]   ;;  %s292_s1 = inlined_call_operand.vmem [shape: f32[32,32], index: 1, kind: input, shape index: {}]   ;;  %s293_s2 = inlined_call_operand.vmem [shape: f32[1,32], index: 2, kind: input, shape index: {}]   ;;  %s294_s3 = inlined_call_operand.hbm [shape: f32[16,32], index: 3, kind: output, shape index: {}]  }
   0x1   :  { %v26_v0 = vld [vmem:[%s292_s1] sm:$0xff]  ;;  %v27_v1 = vld [vmem:[%s292_s1 + $0x8] sm:$0xff]  ;;  %v28_v2 = vld [vmem:[%s292_s1 + $0x10] sm:$0xff]  ;;  %21 = vst.msk [vmem:[#allocation2 + $0x8] sm:$0xff] %vm19_vm0, %v224_v6 }
   0x2   :  { %v184_v3 = vpack.c.bf16 %v27_v1, %v26_v0  ;;  %vm185_vm1 = vmpackc.low %vm19_vm0, %vm19_vm0  ;;  %v29_v4 = vld [vmem:[%s292_s1 + $0x18] sm:$0xff]  ;;  %v24_v5 = vld [vmem:[%s291_s0] sm:$0xff]  ;;  %20 = vst.msk [vmem:[#allocation2] sm:$0xff] %vm19_vm0, %v224_v6 }
   0x3   :  { %v190_v7 = vpack.c.bf16 %v29_v4, %v28_v2  ;;  %181 = vmatprep.mubr.msk.f32.mxu0 %vm19_vm0, %v24_v5 }
   0x4   :  { %8 = vsyncpa [#allocation4], 0  ;;  %186 = vmatprep.subr.msk.bf16.mxu0 %vm185_vm1, %v184_v3  ;;  %v25_v8 = vld [vmem:[%s291_s0 + $0x8] sm:$0xff]  ;;  %v166_v15 = vld [vmem:[%s293_s2] ss:$0 sm:$0xff]  ;;  %s225_s25 = smov [#allocation3]  }
   0x5   :  { %189 = vmatpush3.bf16.xpose.msk.msra.mxu0 %vm185_vm1, %v184_v3  ;;  %s149_s26 = sshll.u32 %s225_s25, 4  ;;  %s150_s26 = int_to_ptr.vmem [resolvable:$true] %s149_s26 }
   0x6   :  { %192 = vmatprep.subr.msk.bf16.mxu0 %vm185_vm1, %v190_v7  ;;  %s200_s0 = scalar_lea.vmem %s150_s26, 256  ;;  %p205_p1 = scmp.lt.s32.totalorder %s150_s26, %s150_s26 }
   0x7   :  { %p201_p0 = scmp.ne.s32.totalorder %s150_s26, %s200_s0  ;;  %p206_p2 = scmp.lt.s32.totalorder %s200_s0, %s200_s0 }
   0x8   :  { %v23_v9 = vld [vmem:[#allocation2 + $0x8] sm:$0xff] }
   0x9   :  { %v22_v10 = vld [vmem:[#allocation2] sm:$0xff]  ;;  %p207_p3 = por %p206_p2, %p205_p1 }
   0xb   :  { %p208_p4 = pnand %p207_p3, %p201_p0 }
   0xd   :  { %195 = vmatpush3.bf16.xpose.msk.msra.mxu0 %vm185_vm1, %v190_v7 }
  0x14   :  { %182 = vmatmul.mubr.msk.f32.vlgmr.msra.gmra.mrb[0].mxu0 %vm19_vm0, %v25_v8 }
  0xe7   :  { %v183_v11 = vpop.f32.mrb[0].mxu0 }
  0xe8   :  { %v125_v12 = vadd.f32 %v183_v11, %v23_v9  ;;  %v115_v13 = vpop.f32.mrb[1].mxu0 }
  0xe9   :  { %v124_v14 = vadd.f32 %v115_v13, %v22_v10 }
  0xea   :  { %127 = vst.msk [vmem:[#allocation2 + $0x8] sm:$0xff] %vm19_vm0, %v125_v12 }
  0xeb   :  { %126 = vst.msk [vmem:[#allocation2] sm:$0xff] %vm19_vm0, %v124_v14 }
  0xf1   :  { %v132_v16 = vld [vmem:[#allocation2 + $0x8] sm:$0xff] }
  0xf2   :  { %v131_v17 = vld [vmem:[#allocation2] sm:$0xff]  ;;  %v141_v18 = vadd.f32 %v166_v15, %v132_v16 }
  0xf3   :  { %v140_v19 = vadd.f32 %v166_v15, %v131_v17 }
  0xf4   :  { %143 = vst.msk [vmem:[#allocation3 + $0x8] sm:$0xff] %vm19_vm0, %v141_v18 }
  0xf5   :  { %142 = vst.msk [vmem:[#allocation3] sm:$0xff] %vm19_vm0, %v140_v19 }
  0xf6   :  { %211 = shalt.err (!%p208_p4)
}
  0xf7   :  { %s212_s28 = scalar_lea.hbm %s294_s3, 256 }
  0xf8   :  { %p213_p5 = scmp.ne.s32.totalorder %s294_s3, %s212_s28  ;;  %p216_p6 = scmp.lt.u32.totalorder %s212_s28, %s294_s3 }
  0xfa   :  { %p218_p7 = pnand %p216_p6, %p213_p5 }
  0xfc   :  { %221 = shalt.err (!%p218_p7)
}
  0xfd   :  { %s226_s6 = smov 128   ;;  %s227_s7 = smov 8  }
  0xfe   :  { %155 = dma.vmem_to_hbm [thread:$0]  %s150_s26, 256, %s294_s3, [#allocation4], %s226_s6, %s226_s6, %s227_s7  }
  0xff   :  { %222 = dma.done.wait [#allocation4], 256  }
 0x100   :  { %223 = vsyncadd [#allocation4], 4294967040 }
 0x101   :  { %159 = vsyncpa [#allocation4], 1 }

// kernel: causal_self_attention.4
= control target key start
LH: loop header
LB: loop body
LE: loop exit
PB: predicated region body
PF: predicated region fallthrough
CT: control target
= control target key end

     0   :  { %s984_s22 = smov 0   ;;  %s986_s23 = smov 0   ;;  %s1083_s0 = inlined_call_operand.<no memory space> [shape: s32[1], index: 0, kind: input, shape index: {}, may-alias: {0,1}]   ;;  %s1084_s1 = inlined_call_operand.<no memory space> [shape: s32[1], index: 1, kind: input, shape index: {}, may-alias: {0,1}]   ;;  %s1085_s2 = inlined_call_operand.vmem [shape: f32[24,8,8], index: 2, kind: input, shape index: {}, may-alias: {2,3,4}]   ;;  %s1086_s3 = inlined_call_operand.vmem [shape: f32[24,8,8], index: 3, kind: input, shape index: {}, may-alias: {2,3,4}]   ;;  %s1087_s4 = inlined_call_operand.vmem [shape: f32[24,8,8], index: 4, kind: input, shape index: {}, may-alias: {2,3,4}]   ;;  %s1088_s5 = inlined_call_operand.vmem [shape: f32[8,8,8], index: 5, kind: output, shape index: {}]  }
   0x1   :  { %10 = sst [smem:[#allocation6]] %s1083_s0  ;;  %s988_s24 = smov 0  }
   0x2   :  { %11 = sst [smem:[#allocation7]] %s1084_s1 }
   0x3 LB: > { %s29_s0 = sadd.s32 1, %s934_s23  ;;  %p824_p0 = scmp.ge.s32.totalorder %s938_s24, 1  ;;  %s938_s24 = sphi %s988_s24, %s17_s24   ;;  %s934_s23 = sphi %s986_s23, %s1090_s23   ;;  %s930_s22 = sphi %s984_s22, %s1089_s22  }
   0x4   : > { %p31_p1 = scmp.ge.s32.totalorder %s29_s0, 8  ;;  %p209_p2 = scmp.lt.s32.totalorder %s938_s24, 9 }
   0x6   : > { %s1092_s0 = smov (%p31_p1, %s29_s0), 0  ;;  %p210_p3 = pnand %p824_p0, %p209_p2 }
   0x7   : > { %s1004_s1 = sld [smem:[#allocation6]] (!%p210_p3)  ;;  %p258_p4 = scmp.lt.s32.totalorder (!%p210_p3), %s930_s22, 23 }
   0x8   : > { %213 = sbr.rel (%p210_p3) target bundleno = 1558 (0x616), region = 32  ;;  %s266_s25 = sadd.s32 (!%p210_p3), 8, %s930_s22 }
   0x9   : > { %s1008_s26 = sld [smem:[#allocation7]] (!%p210_p3)  ;;  %p268_p5 = scmp.lt.s32.totalorder (!%p210_p3), %s266_s25, 23 }
   0xa   : > { %s277_s28 = sadd.s32 (!%p210_p3), 16, %s930_s22  ;;  %p289_p9 = scmp.lt.s32.totalorder (!%p210_p3), %s930_s22, 7 }
   0xb   : > { %p279_p8 = scmp.lt.s32.totalorder (!%p210_p3), %s277_s28, 23 }
   0xd   : > { %p260_p6 = scmp.lt.s32.totalorder (!%p210_p3), %s1004_s1, 0 }
   0xf   : > { %s259_s27 = scalar_select %p258_p4, %s930_s22, 23 }
  0x10   : > { %s1094_s25 = smov (!%p268_p5, %s266_s25), 23  ;;  %p270_p7 = scmp.lt.s32.totalorder %s1008_s26, 0 }
  0x11   : > { %s261_s29 = scalar_select %p260_p6, %s1004_s1, 0 }
  0x12   : > { %s271_s30 = scalar_select %p270_p7, %s1008_s26, 0 }
  0x13   : > { %s262_s6 = sadd.s32 %s261_s29, %s259_s27  ;;  %s1096_s28 = smov (!%p279_p8, %s277_s28), 23 }
  0x14   : > { %s825_s7 = sshll.u32 %s262_s6, 3  ;;  %s272_s8 = sadd.s32 %s271_s30, %s1094_s25 }
  0x15   : > { %s1020_s11 = scalar_lea.vmem %s1085_s2, %s825_s7  ;;  %s826_s12 = sshll.u32 %s272_s8, 3 }
  0x16   : > { %s1025_s15 = scalar_lea.vmem %s1086_s3, %s826_s12  ;;  %s1098_s22 = smov (!%p289_p9, %s930_s22), 7 }
  0x17   : > { %s283_s16 = sadd.s32 %s1096_s28, %s271_s30  ;;  %s293_s18 = sadd.s32 %s1098_s22, %s261_s29 }
  0x18   : > { %s827_s17 = sshll.u32 %s283_s16, 3  ;;  %s1033_s25 = sshll.u32 %s293_s18, 3 }
  0x19   : > { %s1031_s21 = scalar_lea.vmem %s1087_s4, %s827_s17  ;;  %s295_s7 = scalar_lea.vmem %s1088_s5, %s1033_s25 }
  0x1a   : > { %p829_p10 = scmp.ne.s32.totalorder %s1008_s26, 0 }
  0x1b   : > { %vm303_vm0 = vcmask (!%p829_p10), 7168   ;;  %vm306_vm1 = vcmask (!%p829_p10), 64512   ;;  %v940_v0 = vmov (!%p829_p10), -inf   ;;  %v941_v1 = vmov (!%p829_p10), 0.0  }
  0x1c   : > { %302 = sbr.rel (%p829_p10) target bundleno = 35 (0x23), region = 36  ;;  %304 = vst.msk [vmem:[#allocation2] sm:$0xff] (!%p829_p10), %vm303_vm0, %v940_v0  ;;  %305 = vst.msk [vmem:[#allocation3] sm:$0xff] (!%p829_p10), %vm303_vm0, %v941_v1 }
  0x1d   : > { %307 = vst.msk [vmem:[#allocation4] sm:$0xff] (!%p829_p10), %vm306_vm1, %v941_v1 }
  0x23 PF: > { %p830_p11 = scmp.ge.s32.totalorder %s1008_s26, %s1004_s1 }
  0x24   : > { %v313_v2 = vld [vmem:[%s1025_s15] sm:$0xff] (!%p830_p11)  ;;  %vm314_vm2 = vcmask (!%p830_p11), 64512   ;;  %v942_v3 = vmov (!%p830_p11), 0.0   ;;  %vm943_vm3 = vmmov (!%p830_p11), 0   ;;  %v944_v8 = vmov (!%p830_p11), 0   ;;  %v407_v21 = vld [vmem:[#allocation3] sm:$0xff] (!%p830_p11) }
  0x25   : > { %311 = sbr.rel (%p830_p11) target bundleno = 756 (0x2f4), region = 40  ;;  %850 = vmatprep.subr.mxu0 (!%p830_p11), %v942_v3  ;;  %852 = vmatprep.mubr.msk.f32.mxu0 (!%p830_p11), %vm943_vm3, %v942_v3  ;;  %v312_v4 = vld [vmem:[%s1020_s11] sm:$0xff] (!%p830_p11)  ;;  %vm413_vm4 = vcmask (!%p830_p11), 7168   ;;  %v415_v25 = vld [vmem:[#allocation4] sm:$0xff] (!%p830_p11) }
  0x26   : > { %851 = vmatpush3.xpose.msk.msra.mxu0 (!%p830_p11), %vm314_vm2, %v313_v2  ;;  %855 = vmatprep.subr.mxu1 (!%p830_p11), %v942_v3  ;;  %v391_v9 = vld [vmem:[#allocation2] sm:$0xff] (!%p830_p11) }
  0x27   : > { %857 = vmatprep.mubr.msk.f32.mxu1 (!%p830_p11), %vm943_vm3, %v942_v3  ;;  %902 = vset.pattern.permute.xlu0 (!%p830_p11), %v944_v8  ;;  %v422_v13 = vld [vmem:[%s1031_s21] sm:$0xff] (!%p830_p11) }
  0x28   : > { %903 = vset.pattern.permute.xlu1 (!%p830_p11), %v944_v8  ;;  %856 = vmatpush3.msra.mxu1 (!%p830_p11), %v422_v13 }
  0x29   : > { %853 = vmatmul.mubr.msk.f32.vlgmr.msra.gmra.mrb[0].mxu0 (!%p830_p11), %vm314_vm2, %v312_v4 }
  0xfc   : > { %v387_v5 = vpop.f32.mrb[0].mxu0 }
  0xfd   : > { %v854_v6 = vpop.f32.mrb[1].mxu0  ;;  %v392_v7 = vsel %vm314_vm2, %v387_v5, -inf }
  0xfe   : > { %393 = vmax.xlane.f32.xlu0 %v392_v7 }
 0x18b   : > { %v394_v10 = vpop.xlane.xlu0 %393 }
 0x18c   : > { %v395_v11 = vmax.f32 %v391_v9, %v394_v10 }
 0x18e   : > { %v396_v12 = vsub.f32 %v391_v9, %v395_v11  ;;  %498 = vst.msk [vmem:[#allocation2] sm:$0xff] %vm413_vm4, %v395_v11  ;;  %401 = vperm.xlu0 %902, %v395_v11  }
 0x190   : > { %v397_v19 = vmul.f32 1.442695, %v396_v12 }
 0x20d   : > { %v402_v14 = vpop.permute.xlu0 %401 }
 0x20e   : > { %v404_v15 = vsub.f32 %v387_v5, %v402_v14 }
 0x210   : > { %v405_v16 = vmul.f32 1.442695, %v404_v15 }
 0x212   : > { %904 = vpow2.f32 %v405_v16 }
 0x213   : > { %906 = vpow2.f32 %v397_v19 }
 0x21c   : > { %v905_v17 = vpop.eup %904 }
 0x21d   : > { %858 = vmatmul.mubr.msk.f32.vlgmr.msra.gmra.mrb[0].mxu1 %vm314_vm2, %v905_v17  ;;  %v409_v18 = vsel %vm314_vm2, %v905_v17, 0.0  ;;  %v907_v20 = vpop.eup %906 }
 0x21e   : > { %410 = vadd.xlane.f32.xlu1 %v409_v18  ;;  %v408_v22 = vmul.f32 %v907_v20, %v407_v21 }
 0x22f   : > { %418 = vperm.xlu1 %903, %v907_v20  }
 0x2ab   : > { %v411_v23 = vpop.xlane.xlu1 %410 }
 0x2ac   : > { %v412_v24 = vadd.f32 %v411_v23, %v408_v22 }
 0x2ae   : > { %414 = vst.msk [vmem:[#allocation3] sm:$0xff] %vm413_vm4, %v412_v24 }
 0x2af   : > { %v419_v26 = vpop.permute.xlu1 %418 }
 0x2b0   : > { %v421_v27 = vmul.f32 %v419_v26, %v415_v25 }
 0x2f0   : > { %v492_v28 = vpop.f32.mrb[0].mxu1 }
 0x2f1   : > { %v496_v29 = vadd.f32 %v492_v28, %v421_v27  ;;  %v859_v30 = vpop.f32.mrb[1].mxu1 }
 0x2f3   : > { %497 = vst.msk [vmem:[#allocation4] sm:$0xff] %vm314_vm2, %v496_v29 }
 0x2f4 PF: > { %p834_p12 = scmp.ne.s32.totalorder %s1008_s26, %s1004_s1 }
 0x2f5   : > { %v504_v31 = vld [vmem:[%s1025_s15] sm:$0xff] (!%p834_p12)  ;;  %vm505_vm5 = vcmask (!%p834_p12), 64512   ;;  %v945_v32 = vmov (!%p834_p12), 0.0   ;;  %vm946_vm6 = vmmov (!%p834_p12), 0   ;;  %v583_v34 = vlaneseq (!%p834_p12)  ;;  %s837_s22 = sshll.u32 (!%p834_p12), %s1004_s1, 3  ;;  %s838_s28 = sshll.u32 (!%p834_p12), %s1008_s26, 3 }
 0x2f6   : > { %502 = sbr.rel (%p834_p12) target bundleno = 1558 (0x616), region = 44  ;;  %860 = vmatprep.subr.mxu0 (!%p834_p12), %v945_v32  ;;  %862 = vmatprep.mubr.msk.f32.mxu0 (!%p834_p12), %vm946_vm6, %v945_v32  ;;  %v503_v33 = vld [vmem:[%s1020_s11] sm:$0xff] (!%p834_p12)  ;;  %v585_v37 = vstv (!%p834_p12), %s837_s22  ;;  %v590_v38 = vstv (!%p834_p12), %s838_s28  ;;  %v947_v45 = vmov (!%p834_p12), 0   ;;  %vm616_vm8 = vcmask (!%p834_p12), 7168   ;;  %v610_v58 = vld [vmem:[#allocation3] sm:$0xff] (!%p834_p12) }
 0x2f7   : > { %861 = vmatpush3.xpose.msk.msra.mxu0 (!%p834_p12), %vm505_vm5, %v504_v31  ;;  %865 = vmatprep.subr.mxu1 (!%p834_p12), %v945_v32  ;;  %v584_v35 = vshrl.u32 (!%p834_p12), %v583_v34, 7  ;;  %v589_v36 = vand.u32 (!%p834_p12), 127, %v583_v34  ;;  %v594_v46 = vld [vmem:[#allocation2] sm:$0xff] (!%p834_p12) }
 0x2f8   : > { %867 = vmatprep.mubr.msk.f32.mxu1 (!%p834_p12), %vm946_vm6, %v945_v32  ;;  %908 = vset.pattern.permute.xlu0 (!%p834_p12), %v947_v45  ;;  %v625_v50 = vld [vmem:[%s1031_s21] sm:$0xff] (!%p834_p12) }
 0x2f9   : > { %v586_v39 = vadd.s32 (!%p834_p12), %v585_v37, %v584_v35  ;;  %v591_v40 = vadd.s32 (!%p834_p12), %v590_v38, %v589_v36  ;;  %909 = vset.pattern.permute.xlu1 (!%p834_p12), %v947_v45  ;;  %866 = vmatpush3.msra.mxu1 (!%p834_p12), %v625_v50 }
 0x2fa   : > { %863 = vmatmul.mubr.msk.f32.vlgmr.msra.gmra.mrb[0].mxu0 (!%p834_p12), %vm505_vm5, %v503_v33  ;;  %v618_v0 = vld [vmem:[#allocation4] sm:$0xff] (!%p834_p12) }
 0x2fb   : > { %vm592_vm7 = vcmp.ge.s32.totalorder (!%p834_p12), %v586_v39, %v591_v40 }
 0x3cd   : > { %v578_v41 = vpop.f32.mrb[0].mxu0 }
 0x3ce   : > { %v593_v42 = vsel %vm592_vm7, %v578_v41, -1e+30  ;;  %v864_v43 = vpop.f32.mrb[1].mxu0 }
 0x3cf   : > { %v595_v44 = vsel %vm505_vm5, %v593_v42, -inf }
 0x3d0   : > { %596 = vmax.xlane.f32.xlu0 %v595_v44 }
 0x45d   : > { %v597_v47 = vpop.xlane.xlu0 %596 }
 0x45e   : > { %v598_v48 = vmax.f32 %v594_v46, %v597_v47 }
 0x460   : > { %v599_v49 = vsub.f32 %v594_v46, %v598_v48  ;;  %701 = vst.msk [vmem:[#allocation2] sm:$0xff] %vm616_vm8, %v598_v48  ;;  %604 = vperm.xlu0 %908, %v598_v48  }
 0x462   : > { %v600_v56 = vmul.f32 1.442695, %v599_v49 }
 0x4df   : > { %v605_v51 = vpop.permute.xlu0 %604 }
 0x4e0   : > { %v607_v52 = vsub.f32 %v593_v42, %v605_v51 }
 0x4e2   : > { %v608_v53 = vmul.f32 1.442695, %v607_v52 }
 0x4e4   : > { %910 = vpow2.f32 %v608_v53 }
 0x4e5   : > { %912 = vpow2.f32 %v600_v56 }
 0x4ee   : > { %v911_v54 = vpop.eup %910 }
 0x4ef   : > { %868 = vmatmul.mubr.msk.f32.vlgmr.msra.gmra.mrb[0].mxu1 %vm505_vm5, %v911_v54  ;;  %v612_v55 = vsel %vm505_vm5, %v911_v54, 0.0  ;;  %v913_v57 = vpop.eup %912 }
 0x4f0   : > { %613 = vadd.xlane.f32.xlu1 %v612_v55  ;;  %v611_v59 = vmul.f32 %v913_v57, %v610_v58 }
 0x501   : > { %621 = vperm.xlu1 %909, %v913_v57  }
 0x57d   : > { %v614_v60 = vpop.xlane.xlu1 %613 }
 0x57e   : > { %v615_v61 = vadd.f32 %v614_v60, %v611_v59 }
 0x580   : > { %617 = vst.msk [vmem:[#allocation3] sm:$0xff] %vm616_vm8, %v615_v61 }
 0x581   : > { %v622_v1 = vpop.permute.xlu1 %621 }
 0x582   : > { %v624_v2 = vmul.f32 %v622_v1, %v618_v0 }
 0x587   : > { %v702_v62 = vld [vmem:[#allocation3] sm:$0xff] }
 0x588   : > { %914 = vrcp.f32 %v702_v62 }
 0x592   : > { %v915_v63 = vpop.eup %914 }
 0x593   : > { %707 = vperm.xlu1 %909, %v915_v63  }
 0x5c2   : > { %v695_v3 = vpop.f32.mrb[0].mxu1 }
 0x5c3   : > { %v699_v4 = vadd.f32 %v695_v3, %v624_v2  ;;  %v869_v5 = vpop.f32.mrb[1].mxu1 }
 0x5c5   : > { %700 = vst.msk [vmem:[#allocation4] sm:$0xff] %vm505_vm5, %v699_v4 }
 0x5cc   : > { %v704_v6 = vld [vmem:[#allocation4] sm:$0xff] }
 0x612   : > { %v708_v7 = vpop.permute.xlu1 %707 }
 0x613   : > { %v710_v8 = vmul.f32 %v708_v7, %v704_v6 }
 0x615   : > { %711 = vst.msk [vmem:[%s295_s7] sm:$0xff] %vm505_vm5, %v710_v8 }
 0x616 PF: > { %s17_s24 = sadd.s32 1, %s938_s24   ;;  %s1089_s22 = smov %s934_s23 }
 0x617   : > { %p14_p13 = scmp.ge.s32.totalorder %s17_s24, 10   ;;  %s1090_s23 = smov %s1092_s0 }
 0x619   :  { %16 = sbr.rel (!%p14_p13) target bundleno = 3 (0x3), region = 80 }

</bundles_post_ra>
